<compile_context>
chip_gen: v7x
topology: tpu7x:2x2x1
jax: 0.10.0
libtpu: 0.0.40
codegen_flags: <defaults>
</compile_context>

<pallas_src>
import math

import jax
import jax.numpy as jnp
from jax import lax
from jax.experimental import pallas as pl
from jax.experimental.pallas import tpu as pltpu

# ArcFace hyper-parameters (PyTorch defaults: s=64.0, m=0.5, easy_margin=False)
S = 64.0
M = 0.5
COS_M = math.cos(M)
SIN_M = math.sin(M)
TH = math.cos(math.pi - M)
MM = math.sin(math.pi - M) * M
EPS = 1e-12  # F.normalize default eps


def arcface_cosine_kernel(xn_ref, w_ref, o_ref):
    """One class tile: o = s * (x_norm @ w_norm^T).

    xn_ref : (B, D)  normalized input, already in the MXU dtype (bf16 default)
    w_ref  : (TC, D) raw weight tile (f32 or bf16), streamed from HBM
    o_ref  : (B, TC) s * cosine
    """
    xn = xn_ref[...]
    wf = w_ref[...].astype(jnp.float32)

    # Per-row inverse L2 norm (f32 reduce + rsqrt on the EUP), fused with the
    # ArcFace scale s so the matmul result needs no further scaling.
    w_sq = jnp.sum(wf * wf, axis=-1, keepdims=True)              # (TC, 1)
    scale = lax.rsqrt(jnp.maximum(w_sq, EPS * EPS)) * S          # (TC, 1)

    # Single fused (TC, D) multiply + cast to the MXU dtype; contraction on
    # the last dims of both operands (no transpose relayout), f32 accumulate.
    w_mxu = (wf * scale).astype(xn.dtype)                        # (TC, D)
    o_ref[...] = lax.dot_general(
        xn, w_mxu,
        dimension_numbers=(((1,), (1,)), ((), ())),
        preferred_element_type=jnp.float32,
    ).astype(o_ref.dtype)


def arcface_forward(x, weight, label, *, tc=None, out_dtype=jnp.float32,
                    mxu_dtype=jnp.bfloat16, easy_margin=False):
    """ArcFace forward: x (B, D), weight (C, D), label (B,) int -> (B, C)."""
    B, D = x.shape
    C, _ = weight.shape

    # Hoist x normalization out of the per-tile loop (tiny (B, D) op) and cast
    # once to the MXU dtype.
    xf = x.astype(jnp.float32)
    xn = xf * lax.rsqrt(
        jnp.maximum(jnp.sum(xf * xf, axis=-1, keepdims=True), EPS * EPS))
    xn = xn.astype(mxu_dtype)

    # Class-dim tile: 2048 default is safe on v7x (64 MiB/TC VMEM) and keeps
    # several grid steps per TensorCore; pass tc=4096-8192 on 128 MiB parts.
    if tc is None:
        tc = 2048
    if tc >= C:
        tc = C                                # single tile covers the class dim
    else:
        tc = max(128, (tc // 128) * 128)      # lane-aligned streamed tiles
    grid = (pl.cdiv(C, tc),)                  # ragged last block: no pad, no slice

    # VMEM budget: double-buffered weight + output tiles + resident xn + headroom.
    w_bytes = jnp.dtype(weight.dtype).itemsize
    x_bytes = jnp.dtype(xn.dtype).itemsize
    o_bytes = jnp.dtype(out_dtype).itemsize
    needed = 2 * (tc * D * w_bytes + B * tc * o_bytes + B * D * x_bytes)
    vmem_limit = int(min(needed + (4 << 20), 100 << 20))

    logits = pl.pallas_call(
        arcface_cosine_kernel,
        out_shape=jax.ShapeDtypeStruct((B, C), out_dtype),
        grid=grid,
        in_specs=[
            pl.BlockSpec((B, D), lambda j: (0, 0)),    # x_norm: full-resident
            pl.BlockSpec((tc, D), lambda j: (j, 0)),   # weight: streamed tiles
        ],
        out_specs=pl.BlockSpec((B, tc), lambda j: (0, j)),
        compiler_params=pltpu.CompilerParams(
            dimension_semantics=("parallel",),
            vmem_limit_bytes=vmem_limit,
        ),
    )(xn, weight)

    # ArcFace margin touches exactly one logit per row: apply it on B scalars
    # in the wrapper (gather -> margin -> scatter) instead of per output elem.
    rows = jnp.arange(B)
    label = label.astype(jnp.int32)
    cos_t = logits[rows, label].astype(jnp.float32) * (1.0 / S)   # exact: S=2^6
    sin_t = jnp.sqrt(jnp.maximum(1.0 - cos_t * cos_t, 0.0))
    phi_t = cos_t * COS_M - sin_t * SIN_M
    if easy_margin:
        phi_t = jnp.where(cos_t > 0.0, phi_t, cos_t)
    else:
        phi_t = jnp.where(cos_t > TH, phi_t, cos_t - MM)
    return logits.at[rows, label].set((S * phi_t).astype(logits.dtype))


def xavier_uniform(key, shape):
    # nn.init.xavier_uniform_ on (out_features, in_features)
    fan_out, fan_in = shape
    bound = math.sqrt(6.0 / (fan_in + fan_out))
    return jax.random.uniform(key, shape, jnp.float32, -bound, bound)


def arcface_reference(x, weight, label, easy_margin=False):
    """Pure-JAX f32 reference of the PyTorch forward (device_id=None path)."""
    xn = x / jnp.maximum(jnp.linalg.norm(x, axis=-1, keepdims=True), EPS)
    wn = weight / jnp.maximum(
        jnp.linalg.norm(weight, axis=-1, keepdims=True), EPS)
    cosine = xn @ wn.T
    sine = jnp.sqrt(jnp.clip(1.0 - cosine * cosine, 0.0, 1.0))
    phi = cosine * COS_M - sine * SIN_M
    if easy_margin:
        phi = jnp.where(cosine > 0, phi, cosine)
    else:
        phi = jnp.where(cosine > TH, phi, cosine - MM)
    one_hot = jax.nn.one_hot(label, weight.shape[0], dtype=jnp.float32)
    return (one_hot * phi + (1.0 - one_hot) * cosine) * S


if __name__ == "__main__":
    B = 8              # batch
    IN_FEATURES = 64   # embedding dim
    OUT_FEATURES = 512 # number of classes (small demo; real ArcFace is 1e5-1e6)

    key = jax.random.PRNGKey(0)
    kx, kw, kl, kw2, kl2 = jax.random.split(key, 5)

    x = jax.random.normal(kx, (B, IN_FEATURES), jnp.float32)
    weight = xavier_uniform(kw, (OUT_FEATURES, IN_FEATURES))
    label = jax.random.randint(kl, (B,), 0, OUT_FEATURES, jnp.int32)

    # tc=128 -> 4 grid steps, exercising the tiled/pipelined path at demo size.
    out = arcface_forward(x, weight, label, tc=128)
    jax.block_until_ready(out)
    assert out.shape == (B, OUT_FEATURES)
    assert bool(jnp.all(jnp.isfinite(out)))
    ref = arcface_reference(x, weight, label)
    max_err = float(jnp.max(jnp.abs(out - ref)))
    # Loose tolerance: kernel uses bf16 MXU operands, reference is pure f32.
    assert max_err < 1.5, f"max abs error vs f32 reference too large: {max_err}"

    # Ragged class dim (C not a multiple of the tile): no-pad / no-slice path.
    C2 = 320
    w2 = xavier_uniform(kw2, (C2, IN_FEATURES))
    l2 = jax.random.randint(kl2, (B,), 0, C2, jnp.int32)
    out2 = arcface_forward(x, w2, l2, tc=128)
    jax.block_until_ready(out2)
    assert out2.shape == (B, C2)
    assert bool(jnp.all(jnp.isfinite(out2)))
    ref2 = arcface_reference(x, w2, l2)
    max_err2 = float(jnp.max(jnp.abs(out2 - ref2)))
    assert max_err2 < 1.5, f"ragged-path max abs error too large: {max_err2}"

    print("KERNEL_OK")
</pallas_src>

<mosaic_0001>
module attributes {stable_mosaic.version = 11 : i64} {
  func.func @arcface_cosine_kernel(%arg0: i32, %arg1: memref<8x64xbf16, #tpu.memory_space<vmem>>, %arg2: memref<128x64xf32, #tpu.memory_space<vmem>>, %arg3: memref<8x128xf32, #tpu.memory_space<vmem>>) attributes {dimension_semantics = [#tpu.dimension_semantics<parallel>], iteration_bounds = array<i64: 4>, scalar_prefetch = 0 : i64, scratch_operands = 0 : i64, tpu.core_type = #tpu.core_type<tc>, window_params = [{pipeline_mode = #tpu.pipeline_mode<synchronous>, transform_indices = @transform_0, window_bounds = array<i64: 8, 64>}, {transform_indices = @transform_1, window_bounds = array<i64: 128, 64>}, {transform_indices = @transform_2, window_bounds = array<i64: 8, 128>}]} {
    %c0 = arith.constant 0 : index
    %c0_0 = arith.constant 0 : index
    %0 = vector.load %arg1[%c0, %c0_0] : memref<8x64xbf16, #tpu.memory_space<vmem>>, vector<8x64xbf16>
    %c0_1 = arith.constant 0 : index
    %c0_2 = arith.constant 0 : index
    %1 = vector.load %arg2[%c0_1, %c0_2] : memref<128x64xf32, #tpu.memory_space<vmem>>, vector<128x64xf32>
    %2 = arith.mulf %1, %1 : vector<128x64xf32>
    %cst = arith.constant dense<0.000000e+00> : vector<128xf32>
    %3 = vector.multi_reduction <add>, %2, %cst [1] : vector<128x64xf32> to vector<128xf32>
    %4 = vector.shape_cast %3 : vector<128xf32> to vector<128x1xf32>
    %cst_3 = arith.constant 1.000000e-24 : f32
    %5 = vector.broadcast %cst_3 : f32 to vector<128x1xf32>
    %6 = arith.maximumf %4, %5 : vector<128x1xf32>
    %7 = math.rsqrt %6 : vector<128x1xf32>
    %cst_4 = arith.constant 6.400000e+01 : f32
    %8 = vector.broadcast %cst_4 : f32 to vector<128x1xf32>
    %9 = arith.mulf %7, %8 : vector<128x1xf32>
    %10 = vector.broadcast %9 : vector<128x1xf32> to vector<128x64xf32>
    %11 = arith.mulf %1, %10 : vector<128x64xf32>
    %12 = arith.truncf %11 : vector<128x64xf32> to vector<128x64xbf16>
    %cst_5 = arith.constant dense<0.000000e+00> : vector<8x128xf32>
    %13 = tpu.matmul %0, %12, %cst_5 {dimension_numbers = #tpu.dot_dimension_numbers<[1], [1], [0], [0], [0, 0, 1, 0], [], []>} : vector<8x64xbf16>, vector<128x64xbf16>, vector<8x128xf32> -> vector<8x128xf32>
    %c0_6 = arith.constant 0 : index
    %c0_7 = arith.constant 0 : index
    %14 = vector.load %arg3[%c0_6, %c0_7] : memref<8x128xf32, #tpu.memory_space<vmem>>, vector<8x128xf32>
    tpu.vector_store %arg3[%c0_6, %c0_7], %13 {strides = array<i32>} : memref<8x128xf32, #tpu.memory_space<vmem>>, vector<8x128xf32>,
    return
  }
  func.func @transform_0(%arg0: i32) -> (i32, i32) {
    %c0_i32 = arith.constant 0 : i32
    %c0_i32_0 = arith.constant 0 : i32
    %c0_i32_1 = arith.constant 0 : i32
    return %c0_i32, %c0_i32_0 : i32, i32
  }
  func.func @transform_1(%arg0: i32) -> (i32, i32) {
    %c0_i32 = arith.constant 0 : i32
    %c0_i32_0 = arith.constant 0 : i32
    return %arg0, %c0_i32 : i32, i32
  }
  func.func @transform_2(%arg0: i32) -> (i32, i32) {
    %c0_i32 = arith.constant 0 : i32
    %c0_i32_0 = arith.constant 0 : i32
    return %c0_i32, %arg0 : i32, i32
  }
}

</mosaic_0001>

<bundles_post_ra>
// kernel: tpu_custom_call.1
= control target key start
LH: loop header
LB: loop body
LE: loop exit
PB: predicated region body
PF: predicated region fallthrough
CT: control target
= control target key end

     0   :  { %7 = vsyncpa [#allocation3], 0  ;;  %s870_s0 = inlined_call_operand.vmem [shape: bf16[8,64], index: 0, kind: input, shape index: {}]   ;;  %s871_s1 = inlined_call_operand.vmem [shape: f32[512,64], index: 1, kind: input, shape index: {}]   ;;  %s872_s2 = inlined_call_operand.hbm [shape: f32[8,512], index: 2, kind: output, shape index: {}]  }
   0x1   :  { %9 = vsyncpa [#allocation3 + $0x1], 0  ;;  %s636_s9 = smov 0   ;;  %s638_s10 = smov 0  }
   0x2   :  { %s640_s11 = smov 0   ;;  %s642_s12 = smov 0  }
   0x3 LB: > { %s657_s13 = sadd.s32 4294967295, %s616_s12   ;;  %s440_s14 = sadd.s32 4294967294, %s616_s12   ;;  %s616_s12 = sphi %s642_s12, %s878_s12   ;;  %s612_s11 = sphi %s640_s11, %s877_s11   ;;  %s608_s10 = sphi %s638_s10, %s876_s10   ;;  %s604_s9 = sphi %s636_s9, %s875_s9  }
   0x4   : > { %s661_s15 = sadd.s32 1, %s616_s12   ;;  %s69_s16 = sadd.s32 1, %s612_s11 }
   0x5   : > { %s66_s17 = ssub.s32 %s616_s12, %s661_s15  ;;  %p79_p0 = scmp.ne.s32.totalorder %s612_s11, %s608_s10 }
   0x6   : > { %p67_p1 = scmp.eq.s32.totalorder %s66_s17, 0  ;;  %p80_p2 = scmp.eq.s32.totalorder %s657_s13, 3 }
   0x7   : > { %p85_p3 = scmp.ne.s32.totalorder %s608_s10, %s604_s9  ;;  %p86_p4 = scmp.eq.s32.totalorder %s440_s14, 3 }
   0x8   : > { %s672_s18 = scalar_select %p67_p1, %s612_s11, %s69_s16  }
   0x9   : > { %p674_p5 = por %p80_p2, %p79_p0  ;;  %p678_p6 = por %p86_p4, %p85_p3 }
   0xa   : > { %p443_p7 = scmp.ge.s32.totalorder %s616_s12, 1  ;;  %p116_p8 = scmp.lt.s32.totalorder %s616_s12, 5 }
   0xc   : > { %p117_p9 = pnand %p443_p7, %p116_p8 }
   0xd   : > { %s445_s21 = sshll.u32 (!%p117_p9), %s657_s13, 4  ;;  %vm178_vm0 = vcmask (!%p117_p9), 523264   ;;  %v618_v48 = vmov (!%p117_p9), 0.0   ;;  %vm619_vm1 = vmmov (!%p117_p9), 0   ;;  %s135_s28 = sand.u32 (!%p117_p9), 1, %s608_s10  }
   0xe   : > { %120 = sbr.rel (%p117_p9) target bundleno = 484 (0x1e4), region = 28  ;;  %p139_p10 = scmp.lt.s32.totalorder (!%p117_p9), %s445_s21, 63  ;;  %461 = vmatprep.subr.bf16.mxu0 (!%p117_p9), %v618_v48  ;;  %477 = vmatprep.mubr.msk.bf16.mxu0 (!%p117_p9), %vm619_vm1, %v618_v48 }
   0xf   : > { %s444_s29 = sshll.u32 (!%p117_p9), %s135_s28, 3  ;;  %s449_s4 = sshll.u32 (!%p117_p9), %s657_s13, 7 }
  0x10   : > { %s137_s30 = scalar_lea.vmem (!%p117_p9), [#allocation2], %s444_s29  ;;  %s830_s7 = scalar_lea.hbm (!%p117_p9), %s872_s2, %s449_s4 }
  0x11   : > { %s381_s3 = sshll.u32 (!%p117_p9), %s137_s30, 4  ;;  %s368_s8 = scalar_lea.sflag (!%p117_p9), [#allocation3], %s135_s28  ;;  %s825_s3 = int_to_ptr.vmem [resolvable:$true] %s381_s3 }
  0x12   : > { %s554_s14 = scalar_lea.vmem (!%p117_p9), %s825_s3, 128  ;;  %s620_s13 = smov (!%p117_p9), [#allocation2]  }
  0x13   : > { %p555_p11 = scmp.ne.s32.totalorder (!%p117_p9), %s825_s3, %s554_s14  ;;  %s558_s16 = sshll.u32 (!%p117_p9), %s620_s13, 4  ;;  %s559_s16 = int_to_ptr.vmem [resolvable:$false] %s558_s16 }
  0x14   : > { %s560_s17 = scalar_lea.vmem (!%p117_p9), %s559_s16, 256  ;;  %p561_p0 = scmp.lt.s32.totalorder (!%p117_p9), %s825_s3, %s559_s16 }
  0x15   : > { %s880_s21 = smov (!%p139_p10, %s445_s21), 63  ;;  %p556_p12 = pnand %p555_p11, %p674_p5 }
  0x16   : > { %s446_s22 = sshll.u32 %s880_s21, 3  ;;  %p562_p1 = scmp.lt.s32.totalorder %s560_s17, %s554_s14 }
  0x17   : > { %s688_s25 = scalar_lea.vmem %s871_s1, %s446_s22  ;;  %p557_p13 = pneg %p556_p12 }
  0x18   : > { %v691_v0 = vld [vmem:[%s688_s25] sm:$0xff]  ;;  %v694_v1 = vld [vmem:[%s688_s25 + $0x10] sm:$0xff]  ;;  %v697_v2 = vld [vmem:[%s688_s25 + $0x8] sm:$0xff]  ;;  %p563_p2 = por %p562_p1, %p561_p0 }
  0x19   : > { %v162_v3 = vmul.f32 %v691_v0, %v691_v0  ;;  %v164_v4 = vmul.f32 %v694_v1, %v694_v1  ;;  %v163_v5 = vmul.f32 %v697_v2, %v697_v2  ;;  %v706_v6 = vld [vmem:[%s688_s25 + $0x18] sm:$0xff]  ;;  %v711_v8 = vld [vmem:[%s688_s25 + $0x28] sm:$0xff]  ;;  %v714_v9 = vld [vmem:[%s688_s25 + $0x20] sm:$0xff] }
  0x1a   : > { %v165_v7 = vmul.f32 %v706_v6, %v706_v6  ;;  %v167_v14 = vmul.f32 %v711_v8, %v711_v8  ;;  %v166_v15 = vmul.f32 %v714_v9, %v714_v9  ;;  %v725_v16 = vld [vmem:[%s688_s25 + $0x38] sm:$0xff]  ;;  %v728_v17 = vld [vmem:[%s688_s25 + $0x30] sm:$0xff]  ;;  %v737_v22 = vld [vmem:[%s688_s25 + $0x48] sm:$0xff]  ;;  %p564_p3 = pnand %p563_p2, %p557_p13 }
  0x1b   : > { %v179_v10 = vsel %vm178_vm0, %v162_v3, 0.0  ;;  %v185_v11 = vsel %vm178_vm0, %v164_v4, 0.0  ;;  %v182_v12 = vsel %vm178_vm0, %v163_v5, 0.0  ;;  %v169_v20 = vmul.f32 %v725_v16, %v725_v16  ;;  %v740_v23 = vld [vmem:[%s688_s25 + $0x40] sm:$0xff]  ;;  %v749_v28 = vld [vmem:[%s688_s25 + $0x58] sm:$0xff]  ;;  %v752_v29 = vld [vmem:[%s688_s25 + $0x50] sm:$0xff] }
  0x1c   : > { %180 = vadd.xlane.f32.xlu0 %v179_v10  ;;  %186 = vadd.xlane.f32.xlu1 %v185_v11  ;;  %v188_v13 = vsel %vm178_vm0, %v165_v7, 0.0  ;;  %v194_v18 = vsel %vm178_vm0, %v167_v14, 0.0  ;;  %v191_v19 = vsel %vm178_vm0, %v166_v15, 0.0  ;;  %v168_v21 = vmul.f32 %v728_v17, %v728_v17  ;;  %v761_v34 = vld [vmem:[%s688_s25 + $0x68] sm:$0xff]  ;;  %v764_v35 = vld [vmem:[%s688_s25 + $0x60] sm:$0xff]  ;;  %v773_v40 = vld [vmem:[%s688_s25 + $0x78] sm:$0xff] }
  0x1d   : > { %v200_v24 = vsel %vm178_vm0, %v169_v20, 0.0  ;;  %v171_v26 = vmul.f32 %v737_v22, %v737_v22  ;;  %v170_v27 = vmul.f32 %v740_v23, %v740_v23  ;;  %v173_v32 = vmul.f32 %v749_v28, %v749_v28  ;;  %v776_v41 = vld [vmem:[%s688_s25 + $0x70] sm:$0xff] }
  0x1e   : > { %v197_v25 = vsel %vm178_vm0, %v168_v21, 0.0  ;;  %v172_v33 = vmul.f32 %v752_v29, %v752_v29  ;;  %v175_v38 = vmul.f32 %v761_v34, %v761_v34  ;;  %v174_v39 = vmul.f32 %v764_v35, %v764_v35 }
  0x1f   : > { %v206_v30 = vsel %vm178_vm0, %v171_v26, 0.0  ;;  %v203_v31 = vsel %vm178_vm0, %v170_v27, 0.0  ;;  %v212_v36 = vsel %vm178_vm0, %v173_v32, 0.0  ;;  %v177_v44 = vmul.f32 %v773_v40, %v773_v40 }
  0x20   : > { %183 = vadd.xlane.f32.xlu0 %v182_v12  ;;  %189 = vadd.xlane.f32.xlu1 %v188_v13  ;;  %v209_v37 = vsel %vm178_vm0, %v172_v33, 0.0  ;;  %v218_v42 = vsel %vm178_vm0, %v175_v38, 0.0  ;;  %v215_v43 = vsel %vm178_vm0, %v174_v39, 0.0  ;;  %v176_v45 = vmul.f32 %v776_v41, %v776_v41 }
  0x21   : > { %v224_v46 = vsel %vm178_vm0, %v177_v44, 0.0 }
  0x22   : > { %v221_v47 = vsel %vm178_vm0, %v176_v45, 0.0 }
  0x24   : > { %195 = vadd.xlane.f32.xlu1 %v194_v18  ;;  %192 = vadd.xlane.f32.xlu0 %v191_v19 }
  0x28   : > { %201 = vadd.xlane.f32.xlu1 %v200_v24  ;;  %198 = vadd.xlane.f32.xlu0 %v197_v25 }
  0x2c   : > { %207 = vadd.xlane.f32.xlu1 %v206_v30  ;;  %204 = vadd.xlane.f32.xlu0 %v203_v31 }
  0x30   : > { %213 = vadd.xlane.f32.xlu1 %v212_v36  ;;  %210 = vadd.xlane.f32.xlu0 %v209_v37 }
  0x34   : > { %219 = vadd.xlane.f32.xlu1 %v218_v42  ;;  %216 = vadd.xlane.f32.xlu0 %v215_v43 }
  0x38   : > { %225 = vadd.xlane.f32.xlu1 %v224_v46  ;;  %222 = vadd.xlane.f32.xlu0 %v221_v47 }
  0xa9   : > { %v181_v49 = vpop.xlane.xlu0 %180  ;;  %v187_v50 = vpop.xlane.xlu1 %186 }
  0xaa   : > { %v227_v51 = vmax.f32 %v181_v49, 1e-24  ;;  %v229_v52 = vmax.f32 %v187_v50, 1e-24 }
  0xac   : > { %522 = vrsqrt.f32 %v227_v51 }
  0xad   : > { %v184_v53 = vpop.xlane.xlu0 %183  ;;  %v190_v54 = vpop.xlane.xlu1 %189  ;;  %524 = vrsqrt.f32 %v229_v52 }
  0xae   : > { %v228_v55 = vmax.f32 %v184_v53, 1e-24  ;;  %v230_v56 = vmax.f32 %v190_v54, 1e-24 }
  0xb0   : > { %526 = vrsqrt.f32 %v228_v55 }
  0xb1   : > { %528 = vrsqrt.f32 %v230_v56  ;;  %v196_v57 = vpop.xlane.xlu1 %195  ;;  %v193_v58 = vpop.xlane.xlu0 %192 }
  0xb2   : > { %v232_v59 = vmax.f32 %v196_v57, 1e-24  ;;  %v231_v60 = vmax.f32 %v193_v58, 1e-24 }
  0xb4   : > { %530 = vrsqrt.f32 %v232_v59 }
  0xb5   : > { %532 = vrsqrt.f32 %v231_v60  ;;  %v202_v62 = vpop.xlane.xlu1 %201  ;;  %v199_v63 = vpop.xlane.xlu0 %198 }
  0xb6   : > { %v523_v61 = vpop.eup %522  ;;  %v234_v5 = vmax.f32 %v202_v62, 1e-24  ;;  %v233_v10 = vmax.f32 %v199_v63, 1e-24 }
  0xb7   : > { %v525_v3 = vpop.eup %524  ;;  %v259_v4 = vmul.f32 64.0, %v523_v61 }
  0xb8   : > { %v261_v13 = vmul.f32 64.0, %v525_v3  ;;  %534 = vrsqrt.f32 %v234_v5 }
  0xb9   : > { %v275_v15 = vmul.f32 %v259_v4, %v691_v0  ;;  %536 = vrsqrt.f32 %v233_v10  ;;  %v208_v19 = vpop.xlane.xlu1 %207  ;;  %v205_v24 = vpop.xlane.xlu0 %204 }
  0xba   : > { %v527_v7 = vpop.eup %526  ;;  %v277_v27 = vmul.f32 %v261_v13, %v694_v1  ;;  %v236_v31 = vmax.f32 %v208_v19, 1e-24  ;;  %v235_v32 = vmax.f32 %v205_v24, 1e-24 }
  0xbb   : > { %v529_v11 = vpop.eup %528  ;;  %v260_v12 = vmul.f32 64.0, %v527_v7 }
  0xbc   : > { %v262_v14 = vmul.f32 64.0, %v529_v11  ;;  %538 = vrsqrt.f32 %v236_v31 }
  0xbd   : > { %v276_v18 = vmul.f32 %v260_v12, %v697_v2  ;;  %540 = vrsqrt.f32 %v235_v32  ;;  %v214_v36 = vpop.xlane.xlu1 %213  ;;  %v211_v42 = vpop.xlane.xlu0 %210  ;;  %v145_v32 = vld [vmem:[%s870_s0] sm:$0xf] }
  0xbe   : > { %v531_v20 = vpop.eup %530  ;;  %v278_v30 = vmul.f32 %v262_v14, %v706_v6  ;;  %v238_v43 = vmax.f32 %v214_v36, 1e-24  ;;  %v237_v44 = vmax.f32 %v211_v42, 1e-24 }
  0xbf   : > { %v291_v21 = vpack.c.bf16 %v276_v18, %v275_v15  ;;  %v533_v25 = vpop.eup %532  ;;  %v264_v33 = vmul.f32 64.0, %v531_v20 }
  0xc0   : > { %v263_v0 = vmul.f32 64.0, %v533_v25  ;;  %v292_v2 = vpack.c.bf16 %v278_v30, %v277_v27  ;;  %542 = vrsqrt.f32 %v238_v43 }
  0xc1   : > { %v303_v26 = vsel %vm178_vm0, %v291_v21, 0  ;;  %v280_v39 = vmul.f32 %v264_v33, %v711_v8  ;;  %544 = vrsqrt.f32 %v237_v44  ;;  %v220_v49 = vpop.xlane.xlu1 %219  ;;  %v217_v52 = vpop.xlane.xlu0 %216 }
  0xc2   : > { %462 = vmatpush3.bf16.xpose.msra.mxu0 %v303_v26  ;;  %v535_v37 = vpop.eup %534  ;;  %v279_v38 = vmul.f32 %v263_v0, %v714_v9  ;;  %v306_v6 = vsel %vm178_vm0, %v292_v2, 0  ;;  %v240_v54 = vmax.f32 %v220_v49, 1e-24  ;;  %v239_v55 = vmax.f32 %v217_v52, 1e-24 }
  0xc3   : > { %463 = vmatprep.subr.bf16.mxu0 %v618_v48  ;;  %v537_v1 = vpop.eup %536  ;;  %v266_v45 = vmul.f32 64.0, %v535_v37 }
  0xc4   : > { %v265_v46 = vmul.f32 64.0, %v537_v1  ;;  %v293_v47 = vpack.c.bf16 %v280_v39, %v279_v38  ;;  %546 = vrsqrt.f32 %v240_v54 }
  0xc5   : > { %v282_v51 = vmul.f32 %v266_v45, %v725_v16  ;;  %548 = vrsqrt.f32 %v239_v55  ;;  %v226_v59 = vpop.xlane.xlu1 %225  ;;  %v223_v62 = vpop.xlane.xlu0 %222 }
  0xc6   : > { %v539_v50 = vpop.eup %538  ;;  %v309_v9 = vsel %vm178_vm0, %v293_v47, 0  ;;  %v281_v8 = vmul.f32 %v265_v46, %v728_v17  ;;  %v242_v3 = vmax.f32 %v226_v59, 1e-24  ;;  %v241_v4 = vmax.f32 %v223_v62, 1e-24 }
  0xc7   : > { %v541_v53 = vpop.eup %540  ;;  %v268_v56 = vmul.f32 64.0, %v539_v50 }
  0xc8   : > { %v267_v57 = vmul.f32 64.0, %v541_v53  ;;  %v294_v58 = vpack.c.bf16 %v282_v51, %v281_v8  ;;  %550 = vrsqrt.f32 %v242_v3 }
  0xc9   : > { %v284_v16 = vmul.f32 %v268_v56, %v737_v22  ;;  %552 = vrsqrt.f32 %v241_v4 }
  0xca   : > { %464 = vmatpush3.bf16.xpose.msra.mxu0 %v306_v6  ;;  %v543_v60 = vpop.eup %542  ;;  %v312_v61 = vsel %vm178_vm0, %v294_v58, 0  ;;  %v283_v17 = vmul.f32 %v267_v57, %v740_v23 }
  0xcb   : > { %465 = vmatprep.subr.bf16.mxu0 %v618_v48  ;;  %v545_v63 = vpop.eup %544  ;;  %v270_v5 = vmul.f32 64.0, %v543_v60 }
  0xcc   : > { %v269_v7 = vmul.f32 64.0, %v545_v63  ;;  %v295_v10 = vpack.c.bf16 %v284_v16, %v283_v17 }
  0xcd   : > { %v286_v23 = vmul.f32 %v270_v5, %v749_v28 }
  0xce   : > { %v547_v11 = vpop.eup %546  ;;  %v315_v12 = vsel %vm178_vm0, %v295_v10, 0  ;;  %v285_v13 = vmul.f32 %v269_v7, %v752_v29 }
  0xcf   : > { %v549_v22 = vpop.eup %548  ;;  %v272_v14 = vmul.f32 64.0, %v547_v11 }
  0xd0   : > { %v271_v15 = vmul.f32 64.0, %v549_v22  ;;  %v296_v18 = vpack.c.bf16 %v286_v23, %v285_v13 }
  0xd1   : > { %v288_v24 = vmul.f32 %v272_v14, %v761_v34 }
  0xd2   : > { %466 = vmatpush3.bf16.xpose.msra.mxu0 %v309_v9  ;;  %v551_v19 = vpop.eup %550  ;;  %v318_v20 = vsel %vm178_vm0, %v296_v18, 0  ;;  %v287_v21 = vmul.f32 %v271_v15, %v764_v35 }
  0xd3   : > { %467 = vmatprep.subr.bf16.mxu0 %v618_v48  ;;  %v553_v25 = vpop.eup %552  ;;  %v274_v29 = vmul.f32 64.0, %v551_v19 }
  0xd4   : > { %v273_v26 = vmul.f32 64.0, %v553_v25  ;;  %v297_v28 = vpack.c.bf16 %v288_v24, %v287_v21 }
  0xd5   : > { %v290_v27 = vmul.f32 %v274_v29, %v773_v40 }
  0xd6   : > { %v289_v30 = vmul.f32 %v273_v26, %v776_v41  ;;  %v321_v31 = vsel %vm178_vm0, %v297_v28, 0 }
  0xd8   : > { %v298_v35 = vpack.c.bf16 %v290_v27, %v289_v30 }
  0xda   : > { %468 = vmatpush3.bf16.xpose.msra.mxu0 %v312_v61  ;;  %v324_v34 = vsel %vm178_vm0, %v298_v35, 0 }
  0xdb   : > { %469 = vmatprep.subr.bf16.mxu0 %v618_v48 }
  0xe2   : > { %470 = vmatpush3.bf16.xpose.msra.mxu0 %v315_v12 }
  0xe3   : > { %471 = vmatprep.subr.bf16.mxu0 %v618_v48 }
  0xea   : > { %472 = vmatpush3.bf16.xpose.msra.mxu0 %v318_v20 }
  0xeb   : > { %473 = vmatprep.subr.bf16.mxu0 %v618_v48 }
  0xf2   : > { %474 = vmatpush3.bf16.xpose.msra.mxu0 %v321_v31 }
  0xf3   : > { %475 = vmatprep.subr.bf16.mxu0 %v618_v48 }
  0xfa   : > { %476 = vmatpush3.bf16.xpose.msra.mxu0 %v324_v34 }
 0x101   : > { %478 = vmatmul.mubr.msk.bf16.vlgmr.msra.gmra.mrb[0].mxu0 %vm178_vm0, %v145_v32 }
 0x1d4   : > { %v360_v40 = vpop.f32.mrb[0].mxu0 }
 0x1d5   : > { %366 = vst [vmem:[%s137_s30] sm:$0xff] %v360_v40  ;;  %v479_v41 = vpop.f32.mrb[1].mxu0 }
 0x1d6   : > { %v363_v48 = vpop.f32.mrb[2].mxu0 }
 0x1d7   : > { %567 = shalt.err (!%p564_p3)
}
 0x1d8   : > { %s568_s21 = scalar_lea.hbm %s830_s7, 128  ;;  %s572_s24 = scalar_lea.hbm %s872_s2, 512 }
 0x1d9   : > { %p569_p4 = scmp.ne.s32.totalorder %s830_s7, %s568_s21  ;;  %p573_p9 = scmp.lt.u32.totalorder %s830_s7, %s872_s2 }
 0x1da   : > { %p574_p10 = scmp.lt.u32.totalorder %s572_s24, %s568_s21  ;;  %p576_p12 = scmp.lt.u32.totalorder %s568_s21, %s830_s7 }
 0x1db   : > { %p570_p7 = pnand %p569_p4, %p674_p5 }
 0x1dc   : > { %p575_p11 = por %p574_p10, %p573_p9 }
 0x1dd   : > { %p571_p8 = pneg %p570_p7 }
 0x1de   : > { %p577_p13 = por %p576_p12, %p575_p11 }
 0x1e0   : > { %p578_p0 = pnand %p577_p13, %p571_p8 }
 0x1e2   : > { %581 = shalt.err (!%p578_p0)
}
 0x1e3   : > { %481 = dma.vmem_to_hbm [thread:$0]  (%p674_p5), %s825_s3, 128, %s830_s7, %s368_s8   ;;  %v480_v33 = vpop.f32.mrb[3].mxu0 }
 0x1e4 PF: > { %p487_p1 = scmp.ge.s32.totalorder %s616_s12, 2  ;;  %s393_s27 = sand.u32 1, %s604_s9  }
 0x1e5   : > { %s394_s28 = scalar_lea.sflag [#allocation3], %s393_s27 }
 0x1e6   : > { %p484_p2 = pnand %p487_p1, %p678_p6 }
 0x1e8   : > { %599 = dma.done.wait (!%p484_p2), %s394_s28, 128  }
 0x1e9   : > { %601 = vsyncadd (!%p484_p2), %s394_s28, 4294967168  ;;  %p12_p3 = scmp.ge.s32.totalorder %s661_s15, 6   ;;  %s875_s9 = smov %s608_s10 }
 0x1ea   : > { %s876_s10 = smov %s612_s11  ;;  %s877_s11 = smov %s672_s18 }
 0x1eb   : > { %s878_s12 = smov %s661_s15  ;;  %14 = sbr.rel (!%p12_p3) target bundleno = 3 (0x3), region = 63 }
 0x1f2   :  { %399 = vsyncpa [#allocation3], 1 }
 0x1f3   :  { %401 = vsyncpa [#allocation3 + $0x1], 1 }

</bundles_post_ra>
